<compile_context>
chip_gen: v6e
topology: v6e:2x2x1
jax: 0.10.0
libtpu: 0.0.40
codegen_flags: <defaults>
</compile_context>

<pallas_src>
import functools

import jax
import jax.numpy as jnp
from jax.experimental import pallas as pl
from jax.experimental.pallas import tpu as pltpu


def _nt_xent_kernel(q_ref, k_ref, o_ref, l_sc, pos_sc, *rest, shift, tile,
                    n_valid, batch_size, use_online_max, has_pad):
    """One (TILE, TILE) tile of the logit matrix folded into running row stats.

    q_ref:   (TILE, D) bf16 row block of the scaled, L2-normalized features.
    k_ref:   (TILE, D) bf16 column block (same array, different rows).
    o_ref:   (TILE, 1) f32 per-row (logsumexp - positive logit), written at the
             last kv step.
    l_sc:    (TILE, 1) running (shifted) exp-sum.
    pos_sc:  (TILE, 1) accumulated positive logit.
    rest:    (m_sc,) running row-max scratch — only present when use_online_max.
    """
    qi = pl.program_id(0)
    ki = pl.program_id(1)

    @pl.when(ki == 0)
    def _init():
        l_sc[...] = jnp.zeros_like(l_sc)
        pos_sc[...] = jnp.zeros_like(pos_sc)
        if use_online_max:
            rest[0][...] = jnp.full_like(rest[0], -1e30)

    # (TILE, TILE) logit tile on the MXU.  NT-form contraction (dim 1 of both
    # operands) so Mosaic never materializes a transposed copy of k; bf16 x bf16
    # with f32 accumulation.  The 1/temperature scale is already in the operands.
    s = jax.lax.dot_general(
        q_ref[...], k_ref[...],
        dimension_numbers=(((1,), (1,)), ((), ())),
        preferred_element_type=jnp.float32,
    )

    row_ids = qi * tile + jax.lax.broadcasted_iota(jnp.int32, (tile, 1), 0)
    col_ids = ki * tile + jax.lax.broadcasted_iota(jnp.int32, (1, tile), 1)

    # Positive logit of row i sits at column i+B (i < B) or i-B (i >= B).  Pull
    # it straight out of the streamed tile (exactly one kv step matches) instead
    # of loading a separate partner block.
    pos_col = jnp.where(row_ids < batch_size,
                        row_ids + batch_size, row_ids - batch_size)
    pos_sc[...] += jnp.sum(jnp.where(col_ids == pos_col, s, 0.0),
                           axis=1, keepdims=True)

    # Mask the self-similarity diagonal (and padded columns, if any).  No
    # post-exp re-mask is needed: exp(-1e30 - shift) underflows to exactly 0.
    invalid = row_ids == col_ids
    if has_pad:
        invalid = invalid | (col_ids >= n_valid)
    s = jnp.where(invalid, -1e30, s)

    if use_online_max:
        # Fallback for very small temperatures where exp(s - 1/T) could
        # underflow f32: classic online logsumexp with a running row max.
        m_sc = rest[0]
        m_prev = m_sc[...]
        m_new = jnp.maximum(m_prev, jnp.max(s, axis=1, keepdims=True))
        l_sc[...] = (jnp.exp(m_prev - m_new) * l_sc[...]
                     + jnp.sum(jnp.exp(s - m_new), axis=1, keepdims=True))
        m_sc[...] = m_new
    else:
        # Cosine logits are bounded: |s| <= 1/T == shift, so a static shift is
        # exact enough.  No cross-lane max, no alpha rescale, and no loop-carried
        # dependency through a running max across kv steps.
        l_sc[...] += jnp.sum(jnp.exp(s - shift), axis=1, keepdims=True)

    @pl.when(ki == pl.num_programs(1) - 1)
    def _finalize():
        if use_online_max:
            lse = rest[0][...] + jnp.log(l_sc[...])
        else:
            lse = shift + jnp.log(l_sc[...])
        o_ref[...] = lse - pos_sc[...]


def _round_up(x, m):
    return (x + m - 1) // m * m


def _vmem_budget():
    """Per-core VMEM limit + tile budget, generation-aware (v7x: 64 MiB/core,
    v5e/v6e: 128 MiB).  Falls back to the v7x floor if the query fails."""
    cap = 64 * 1024 * 1024
    try:
        info = pltpu.get_tpu_info()
        cap = int(getattr(info, "vmem_capacity_bytes", cap))
    except Exception:
        pass
    limit = max(32 * 1024 * 1024, min(cap - 16 * 1024 * 1024, 100 * 1024 * 1024))
    return int(limit * 0.7), int(limit)


def _choose_tile(n, d, vmem_budget):
    """Row/column tile: as large as VMEM allows (fewer full re-streams of K),
    8-row aligned for any batch size, with bounded padding waste."""
    def est(t):  # double-buffered bf16 Q + K blocks, plus f32 row stats/output
        return 2 * (2 * t * d * 2) + 64 * t

    if n <= 256:
        t = _round_up(max(n, 8), 8)
    else:
        t = 128
        for cand in (512, 256):
            if est(cand) <= vmem_budget and 4 * _round_up(n, cand) <= 5 * n:
                t = cand
                break
    while t > 8 and est(t) > vmem_budget:
        t = max(8, _round_up(t // 2, 8))
    return t


def nt_xent_pallas(z_i, z_j, temperature=0.1):
    z_i = jnp.asarray(z_i, jnp.float32)
    z_j = jnp.asarray(z_j, jnp.float32)
    batch_size, d = z_i.shape
    n = 2 * batch_size
    inv_temp = 1.0 / float(temperature)

    # F.normalize(x, p=2, dim=1) == x * rsqrt(max(||x||^2, 1e-24)), done once in
    # f32; 1/temperature is folded in (sqrt per operand so the dot carries the
    # full 1/T), then the MXU operands are cast to bf16 (f32 accumulation).
    z = jnp.concatenate([z_i, z_j], axis=0)
    inv_norm = jax.lax.rsqrt(
        jnp.maximum(jnp.sum(z * z, axis=1, keepdims=True), jnp.float32(1e-24)))
    zn = (z * (inv_norm * jnp.float32(inv_temp ** 0.5))).astype(jnp.bfloat16)

    vmem_budget, vmem_limit = _vmem_budget()
    tile = _choose_tile(n, d, vmem_budget)
    n_pad = _round_up(n, tile)
    if n_pad > n:
        zn = jnp.pad(zn, ((0, n_pad - n), (0, 0)))
    n_blocks = n_pad // tile

    # Static shift is valid because |sim|/T <= 1/T; for very small temperatures
    # exp(-2/T) would underflow f32, so keep the online-max path as a fallback.
    use_online_max = inv_temp > 40.0

    kernel = functools.partial(
        _nt_xent_kernel,
        shift=float(inv_temp), tile=tile, n_valid=n, batch_size=batch_size,
        use_online_max=use_online_max, has_pad=(n_pad > n))

    scratch = [pltpu.VMEM((tile, 1), jnp.float32),   # running (shifted) exp-sum
               pltpu.VMEM((tile, 1), jnp.float32)]   # positive-logit accumulator
    if use_online_max:
        scratch.append(pltpu.VMEM((tile, 1), jnp.float32))  # running row max

    per_row = pl.pallas_call(
        kernel,
        out_shape=jax.ShapeDtypeStruct((n_pad, 1), jnp.float32),
        grid_spec=pltpu.PrefetchScalarGridSpec(
            num_scalar_prefetch=0,
            grid=(n_blocks, n_blocks),            # reduction (kv) axis innermost
            in_specs=[
                pl.BlockSpec((tile, d), lambda qi, ki: (qi, 0)),  # Q row block
                pl.BlockSpec((tile, d), lambda qi, ki: (ki, 0)),  # K col block
            ],
            out_specs=pl.BlockSpec((tile, 1), lambda qi, ki: (qi, 0)),
            scratch_shapes=scratch,
        ),
        compiler_params=pltpu.CompilerParams(
            dimension_semantics=("parallel", "arbitrary"),
            vmem_limit_bytes=vmem_limit,
        ),
    )(zn, zn)

    row_idx = jnp.arange(n_pad)
    per_row = jnp.where(row_idx < n, per_row[:, 0], 0.0)   # drop padded rows
    return jnp.sum(per_row) / jnp.float32(n)


# ---------------------------------------------------------------------------
# Pure-JAX reference that mirrors the PyTorch module literally (for checking).
# ---------------------------------------------------------------------------
def _nt_xent_ref(z_i, z_j, temperature=0.1):
    def normalize(x):
        nrm = jnp.maximum(jnp.linalg.norm(x, axis=1, keepdims=True), 1e-12)
        return x / nrm

    z_i = normalize(z_i)
    z_j = normalize(z_j)
    b = z_i.shape[0]
    N = 2 * b
    z = jnp.concatenate([z_i, z_j], axis=0)
    sim = z @ z.T
    sim_i_j = jnp.diagonal(sim, offset=b)
    sim_j_i = jnp.diagonal(sim, offset=-b)
    positive = jnp.concatenate([sim_i_j, sim_j_i], axis=0).reshape(N, 1)

    mask = jnp.ones((N, N), dtype=bool)
    idx = jnp.arange(N)
    mask = mask.at[idx, idx].set(False)
    mask = mask.at[jnp.arange(b), jnp.arange(b) + b].set(False)
    mask = mask.at[jnp.arange(b) + b, jnp.arange(b)].set(False)
    negatives = sim[mask].reshape(N, N - 2)

    logits = jnp.concatenate([positive, negatives], axis=1) / temperature
    # CrossEntropyLoss(reduction='sum') with labels == 0
    lse = jax.scipy.special.logsumexp(logits, axis=1)
    loss = jnp.sum(lse - logits[:, 0]) / N
    return loss


if __name__ == "__main__":
    key = jax.random.PRNGKey(0)
    k1, k2 = jax.random.split(key)
    batch, dim = 8, 32
    z_i = jax.random.normal(k1, (batch, dim), dtype=jnp.float32)
    z_j = jax.random.normal(k2, (batch, dim), dtype=jnp.float32)

    loss_fn = jax.jit(functools.partial(nt_xent_pallas, temperature=0.1))
    loss = jax.block_until_ready(loss_fn(z_i, z_j))

    ref = _nt_xent_ref(z_i, z_j, temperature=0.1)
    # bf16 MXU operands (per the perf review) loosen accuracy vs the f32
    # reference from ~1e-5 to the 1e-3..1e-2 range.
    assert jnp.allclose(loss, ref, rtol=2e-2, atol=2e-2), (loss, ref)

    print("KERNEL_OK")
</pallas_src>

<mosaic_0001>
module attributes {stable_mosaic.version = 11 : i64} {
  func.func @_nt_xent_kernel(%arg0: i32, %arg1: i32, %arg2: memref<16x32xbf16, #tpu.memory_space<vmem>>, %arg3: memref<16x32xbf16, #tpu.memory_space<vmem>>, %arg4: memref<16x1xf32, #tpu.memory_space<vmem>>, %arg5: memref<16x1xf32, #tpu.memory_space<vmem>>, %arg6: memref<16x1xf32, #tpu.memory_space<vmem>>) attributes {dimension_semantics = [#tpu.dimension_semantics<parallel>, #tpu.dimension_semantics<arbitrary>], iteration_bounds = array<i64: 1, 1>, scalar_prefetch = 0 : i64, scratch_operands = 2 : i64, tpu.core_type = #tpu.core_type<tc>, window_params = [{transform_indices = @transform_0, window_bounds = array<i64: 16, 32>}, {transform_indices = @transform_1, window_bounds = array<i64: 16, 32>}, {transform_indices = @transform_2, window_bounds = array<i64: 16, 1>}]} {
    %c0_i32 = arith.constant 0 : i32
    %0 = arith.cmpi eq, %arg1, %c0_i32 : i32
    %1 = arith.extui %0 : i1 to i32
    %c0_i32_0 = arith.constant 0 : i32
    %2 = arith.cmpi ne, %1, %c0_i32_0 : i32
    scf.if %2 {
      %cst_22 = arith.constant 0.000000e+00 : f32
      %47 = vector.broadcast %cst_22 : f32 to vector<16x1xf32>
      %c0_23 = arith.constant 0 : index
      %c0_24 = arith.constant 0 : index
      %48 = vector.load %arg5[%c0_23, %c0_24] : memref<16x1xf32, #tpu.memory_space<vmem>>, vector<16x1xf32>
      tpu.vector_store %arg5[%c0_23, %c0_24], %47 {strides = array<i32>} : memref<16x1xf32, #tpu.memory_space<vmem>>, vector<16x1xf32>,
      %cst_25 = arith.constant 0.000000e+00 : f32
      %49 = vector.broadcast %cst_25 : f32 to vector<16x1xf32>
      %c0_26 = arith.constant 0 : index
      %c0_27 = arith.constant 0 : index
      %50 = vector.load %arg6[%c0_26, %c0_27] : memref<16x1xf32, #tpu.memory_space<vmem>>, vector<16x1xf32>
      tpu.vector_store %arg6[%c0_26, %c0_27], %49 {strides = array<i32>} : memref<16x1xf32, #tpu.memory_space<vmem>>, vector<16x1xf32>,
    } else {
    }
    %c0 = arith.constant 0 : index
    %c0_1 = arith.constant 0 : index
    %3 = vector.load %arg2[%c0, %c0_1] : memref<16x32xbf16, #tpu.memory_space<vmem>>, vector<16x32xbf16>
    %c0_2 = arith.constant 0 : index
    %c0_3 = arith.constant 0 : index
    %4 = vector.load %arg3[%c0_2, %c0_3] : memref<16x32xbf16, #tpu.memory_space<vmem>>, vector<16x32xbf16>
    %cst = arith.constant dense<0.000000e+00> : vector<16x16xf32>
    %5 = tpu.matmul %3, %4, %cst {dimension_numbers = #tpu.dot_dimension_numbers<[1], [1], [0], [0], [0, 0, 1, 0], [], []>} : vector<16x32xbf16>, vector<16x32xbf16>, vector<16x16xf32> -> vector<16x16xf32>
    %c16_i32 = arith.constant 16 : i32
    %6 = arith.muli %arg0, %c16_i32 : i32
    %7 = tpu.iota {dimensions = array<i32: 0>} : vector<16x1xi32>
    %8 = vector.broadcast %6 : i32 to vector<16x1xi32>
    %9 = arith.addi %8, %7 : vector<16x1xi32>
    %c16_i32_4 = arith.constant 16 : i32
    %10 = arith.muli %arg1, %c16_i32_4 : i32
    %11 = tpu.iota {dimensions = array<i32: 1>} : vector<1x16xi32>
    %12 = vector.broadcast %10 : i32 to vector<1x16xi32>
    %13 = arith.addi %12, %11 : vector<1x16xi32>
    %c8_i32 = arith.constant 8 : i32
    %14 = vector.broadcast %c8_i32 : i32 to vector<16x1xi32>
    %15 = arith.cmpi slt, %9, %14 : vector<16x1xi32>
    %c8_i32_5 = arith.constant 8 : i32
    %16 = vector.broadcast %c8_i32_5 : i32 to vector<16x1xi32>
    %17 = arith.addi %9, %16 : vector<16x1xi32>
    %c8_i32_6 = arith.constant 8 : i32
    %18 = vector.broadcast %c8_i32_6 : i32 to vector<16x1xi32>
    %19 = arith.subi %9, %18 : vector<16x1xi32>
    %20 = arith.select %15, %17, %19 : vector<16x1xi1>, vector<16x1xi32>
    %c0_7 = arith.constant 0 : index
    %c0_8 = arith.constant 0 : index
    %21 = vector.load %arg6[%c0_7, %c0_8] : memref<16x1xf32, #tpu.memory_space<vmem>>, vector<16x1xf32>
    %22 = vector.broadcast %13 : vector<1x16xi32> to vector<16x16xi32>
    %23 = vector.broadcast %20 : vector<16x1xi32> to vector<16x16xi32>
    %24 = arith.cmpi eq, %22, %23 : vector<16x16xi32>
    %cst_9 = arith.constant 0.000000e+00 : f32
    %25 = vector.broadcast %cst_9 : f32 to vector<16x16xf32>
    %26 = arith.select %24, %5, %25 : vector<16x16xi1>, vector<16x16xf32>
    %cst_10 = arith.constant dense<0.000000e+00> : vector<16xf32>
    %27 = vector.multi_reduction <add>, %26, %cst_10 [1] : vector<16x16xf32> to vector<16xf32>
    %28 = vector.shape_cast %27 : vector<16xf32> to vector<16x1xf32>
    %29 = arith.addf %21, %28 : vector<16x1xf32>
    %c0_11 = arith.constant 0 : index
    %c0_12 = arith.constant 0 : index
    %30 = vector.load %arg6[%c0_11, %c0_12] : memref<16x1xf32, #tpu.memory_space<vmem>>, vector<16x1xf32>
    tpu.vector_store %arg6[%c0_11, %c0_12], %29 {strides = array<i32>} : memref<16x1xf32, #tpu.memory_space<vmem>>, vector<16x1xf32>,
    %31 = vector.broadcast %9 : vector<16x1xi32> to vector<16x16xi32>
    %32 = vector.broadcast %13 : vector<1x16xi32> to vector<16x16xi32>
    %33 = arith.cmpi eq, %31, %32 : vector<16x16xi32>
    %cst_13 = arith.constant -1.000000e+30 : f32
    %34 = vector.broadcast %cst_13 : f32 to vector<16x16xf32>
    %35 = arith.select %33, %34, %5 : vector<16x16xi1>, vector<16x16xf32>
    %c0_14 = arith.constant 0 : index
    %c0_15 = arith.constant 0 : index
    %36 = vector.load %arg5[%c0_14, %c0_15] : memref<16x1xf32, #tpu.memory_space<vmem>>, vector<16x1xf32>
    %cst_16 = arith.constant 1.000000e+01 : f32
    %37 = vector.broadcast %cst_16 : f32 to vector<16x16xf32>
    %38 = arith.subf %35, %37 : vector<16x16xf32>
    %39 = math.exp %38 : vector<16x16xf32>
    %cst_17 = arith.constant dense<0.000000e+00> : vector<16xf32>
    %40 = vector.multi_reduction <add>, %39, %cst_17 [1] : vector<16x16xf32> to vector<16xf32>
    %41 = vector.shape_cast %40 : vector<16xf32> to vector<16x1xf32>
    %42 = arith.addf %36, %41 : vector<16x1xf32>
    %c0_18 = arith.constant 0 : index
    %c0_19 = arith.constant 0 : index
    %43 = vector.load %arg5[%c0_18, %c0_19] : memref<16x1xf32, #tpu.memory_space<vmem>>, vector<16x1xf32>
    tpu.vector_store %arg5[%c0_18, %c0_19], %42 {strides = array<i32>} : memref<16x1xf32, #tpu.memory_space<vmem>>, vector<16x1xf32>,
    %c0_i32_20 = arith.constant 0 : i32
    %44 = arith.cmpi eq, %arg1, %c0_i32_20 : i32
    %45 = arith.extui %44 : i1 to i32
    %c0_i32_21 = arith.constant 0 : i32
    %46 = arith.cmpi ne, %45, %c0_i32_21 : i32
    scf.if %46 {
      %c0_22 = arith.constant 0 : index
      %c0_23 = arith.constant 0 : index
      %47 = vector.load %arg5[%c0_22, %c0_23] : memref<16x1xf32, #tpu.memory_space<vmem>>, vector<16x1xf32>
      %48 = math.log %47 : vector<16x1xf32>
      %cst_24 = arith.constant 1.000000e+01 : f32
      %49 = vector.broadcast %cst_24 : f32 to vector<16x1xf32>
      %50 = arith.addf %49, %48 : vector<16x1xf32>
      %c0_25 = arith.constant 0 : index
      %c0_26 = arith.constant 0 : index
      %51 = vector.load %arg6[%c0_25, %c0_26] : memref<16x1xf32, #tpu.memory_space<vmem>>, vector<16x1xf32>
      %52 = arith.subf %50, %51 : vector<16x1xf32>
      %c0_27 = arith.constant 0 : index
      %c0_28 = arith.constant 0 : index
      %53 = vector.load %arg4[%c0_27, %c0_28] : memref<16x1xf32, #tpu.memory_space<vmem>>, vector<16x1xf32>
      tpu.vector_store %arg4[%c0_27, %c0_28], %52 {strides = array<i32>} : memref<16x1xf32, #tpu.memory_space<vmem>>, vector<16x1xf32>,
    } else {
    }
    return
  }
  func.func @transform_0(%arg0: i32, %arg1: i32) -> (i32, i32) {
    %c0_i32 = arith.constant 0 : i32
    %c0_i32_0 = arith.constant 0 : i32
    return %arg0, %c0_i32 : i32, i32
  }
  func.func @transform_1(%arg0: i32, %arg1: i32) -> (i32, i32) {
    %c0_i32 = arith.constant 0 : i32
    %c0_i32_0 = arith.constant 0 : i32
    return %arg1, %c0_i32 : i32, i32
  }
  func.func @transform_2(%arg0: i32, %arg1: i32) -> (i32, i32) {
    %c0_i32 = arith.constant 0 : i32
    %c0_i32_0 = arith.constant 0 : i32
    return %arg0, %c0_i32 : i32, i32
  }
}

</mosaic_0001>

<bundles_post_ra>
// kernel: nt_xent_pallas.1
= control target key start
LH: loop header
LB: loop body
LE: loop exit
PB: predicated region body
PF: predicated region fallthrough
CT: control target
= control target key end

     0   :  { %vm35_vm0 = vcmask 261120   ;;  %v191_v0 = vmov 0.0   ;;  %vm192_vm1 = vmmov 0   ;;  %vm16_vm2 = vcmask 7168   ;;  %s234_s1 = inlined_call_operand.vmem [shape: bf16[16,32], index: 1, kind: input, shape index: {}, may-alias: {0,1}]   ;;  %s235_s0 = inlined_call_operand.vmem [shape: bf16[16,32], index: 0, kind: input, shape index: {}, may-alias: {0,1}]   ;;  %s236_s2 = inlined_call_operand.vmem [shape: f32[16,1], index: 2, kind: output, shape index: {}]  }
   0x1   :  { %173 = vmatprep.subr.bf16.mxu0 %v191_v0  ;;  %v181_v1 = vld [vmem:[%s234_s1] sm:$0xff]   ;;  %175 = vmatprep.mubr.msk.bf16.mxu0 %vm192_vm1, %v191_v0  ;;  %19 = vst.msk [vmem:[#allocation3] sm:$0xff] %vm16_vm2, %v191_v0  ;;  %17 = vst.msk [vmem:[#allocation2] sm:$0xff] %vm16_vm2, %v191_v0  ;;  %v84_v4 = vlaneseq  ;;  %vm109_vm5 = vcmask 130048  }
   0x2   :  { %v40_v2 = vsel %vm35_vm0, %v181_v1, 0  ;;  %v182_v3 = vld [vmem:[%s235_s0] sm:$0xff]   ;;  %18 = vst.msk [vmem:[#allocation2 + $0x8] sm:$0xff] %vm16_vm2, %v191_v0  ;;  %20 = vst.msk [vmem:[#allocation3 + $0x8] sm:$0xff] %vm16_vm2, %v191_v0 }
   0x3   :  { %174 = vmatpush3.bf16.xpose.msra.mxu0 %v40_v2  ;;  %v85_v5 = vshrl.u32 %v84_v4, 7  ;;  %v92_v6 = vand.u32 127, %v84_v4 }
   0x5   :  { %v86_v7 = vadd.s32 8, %v85_v5  ;;  %vm121_vm3 = vcmp.eq.s32.totalorder %v85_v5, %v92_v6 }
   0x7   :  { %vm105_vm4 = vcmp.eq.s32.totalorder %v92_v6, %v86_v7  ;;  %v168_v8 = vadd.s32 4294967288, %v86_v7  ;;  %vm122_vm6 = vcmp.eq.s32.totalorder %v86_v7, %v92_v6 }
   0x8   :  { %v103_v27 = vld [vmem:[#allocation3] sm:$0xff]  ;;  %v125_v33 = vld [vmem:[#allocation2] sm:$0xff] }
   0x9   :  { %vm106_vm7 = vcmp.eq.s32.totalorder %v92_v6, %v168_v8  ;;  %v104_v30 = vld [vmem:[#allocation3 + $0x8] sm:$0xff]  ;;  %v126_v36 = vld [vmem:[#allocation2 + $0x8] sm:$0xff] }
   0xa   :  { %176 = vmatmul.mubr.msk.bf16.vlgmr.msra.gmra.mxu0 %vm35_vm0, %v182_v3 }
  0xca   :  { %v76_v9 = vpop.f32.mrf.mxu0 }
  0xcb   :  { %v123_v10 = vsel %vm121_vm3, -1e+30, %v76_v9  ;;  %v107_v11 = vsel %vm105_vm4, %v76_v9, 0.0 }
  0xcc   :  { %v169_v12 = vadd.f32 -10.0, %v123_v10  ;;  %v177_v13 = vpop.f32.mrf.mxu0  ;;  %v110_v14 = vsel %vm109_vm5, %v107_v11, 0.0 }
  0xcd   :  { %111 = vadd.xlane.f32.xlu1 %v110_v14 }
  0xce   :  { %v129_v15 = vmul.f32 1.442695, %v169_v12  ;;  %v79_v16 = vpop.f32.mrf.mxu0 }
  0xcf   :  { %v124_v17 = vsel %vm122_vm6, -1e+30, %v79_v16  ;;  %v108_v18 = vsel %vm106_vm7, %v79_v16, 0.0 }
  0xd0   :  { %183 = vpow2.f32 %v129_v15  ;;  %v170_v19 = vadd.f32 -10.0, %v124_v17  ;;  %v178_v20 = vpop.f32.mrf.mxu0  ;;  %v113_v21 = vsel %vm109_vm5, %v108_v18, 0.0 }
  0xd1   :  { %114 = vadd.xlane.f32.xlu1 %v113_v21 }
  0xd2   :  { %v131_v22 = vmul.f32 1.442695, %v170_v19 }
  0xd4   :  { %185 = vpow2.f32 %v131_v22 }
  0xdd   :  { %v184_v23 = vpop.eup %183 }
  0xde   :  { %v133_v24 = vsel %vm109_vm5, %v184_v23, 0.0 }
  0xdf   :  { %134 = vadd.xlane.f32.xlu0 %v133_v24 }
  0xe1   :  { %v186_v25 = vpop.eup %185 }
  0xe2   :  { %v136_v26 = vsel %vm109_vm5, %v186_v25, 0.0 }
  0xe3   :  { %137 = vadd.xlane.f32.xlu0 %v136_v26 }
 0x156   :  { %v112_v28 = vpop.xlane.xlu1 %111 }
 0x157   :  { %v116_v29 = vadd.f32 %v112_v28, %v103_v27 }
 0x159   :  { %119 = vst.msk [vmem:[#allocation3] sm:$0xff] %vm16_vm2, %v116_v29 }
 0x15a   :  { %v115_v31 = vpop.xlane.xlu1 %114 }
 0x15b   :  { %v117_v32 = vadd.f32 %v115_v31, %v104_v30 }
 0x15d   :  { %120 = vst.msk [vmem:[#allocation3 + $0x8] sm:$0xff] %vm16_vm2, %v117_v32 }
 0x160   :  { %v154_v45 = vld [vmem:[#allocation3] sm:$0xff] }
 0x164   :  { %v155_v49 = vld [vmem:[#allocation3 + $0x8] sm:$0xff] }
 0x168   :  { %v135_v34 = vpop.xlane.xlu0 %134 }
 0x169   :  { %v139_v35 = vadd.f32 %v135_v34, %v125_v33 }
 0x16b   :  { %141 = vst.msk [vmem:[#allocation2] sm:$0xff] %vm16_vm2, %v139_v35 }
 0x16c   :  { %v138_v37 = vpop.xlane.xlu0 %137 }
 0x16d   :  { %v140_v38 = vadd.f32 %v138_v37, %v126_v36 }
 0x16f   :  { %142 = vst.msk [vmem:[#allocation2 + $0x8] sm:$0xff] %vm16_vm2, %v140_v38 }
 0x172   :  { %v146_v39 = vld [vmem:[#allocation2] sm:$0xff] }
 0x173   :  { %187 = vlog2.f32 %v146_v39 }
 0x176   :  { %v147_v40 = vld [vmem:[#allocation2 + $0x8] sm:$0xff] }
 0x177   :  { %189 = vlog2.f32 %v147_v40 }
 0x180   :  { %v188_v41 = vpop.eup %187 }
 0x181   :  { %v149_v42 = vmul.f32 0.6931472, %v188_v41 }
 0x183   :  { %v152_v43 = vadd.f32 10.0, %v149_v42 }
 0x184   :  { %v190_v44 = vpop.eup %189 }
 0x185   :  { %v156_v46 = vsub.f32 %v152_v43, %v154_v45  ;;  %v151_v47 = vmul.f32 0.6931472, %v190_v44 }
 0x187   :  { %158 = vst.msk [vmem:[%s236_s2] sm:$0xff] %vm16_vm2, %v156_v46  ;;  %v153_v48 = vadd.f32 10.0, %v151_v47 }
 0x189   :  { %v157_v50 = vsub.f32 %v153_v48, %v155_v49 }
 0x18b   :  { %159 = vst.msk [vmem:[%s236_s2 + $0x8] sm:$0xff] %vm16_vm2, %v157_v50 }

</bundles_post_ra>
